<compile_context>
chip_gen: v7x
topology: tpu7x:2x2x1
jax: 0.10.0
libtpu: 0.0.40
codegen_flags: <defaults>
</compile_context>

<pallas_src>
import functools
import math

import jax
import jax.numpy as jnp
import numpy as np
from jax import lax
from jax.experimental import pallas as pl
from jax.experimental.pallas import tpu as pltpu


def _mha_fused_kernel(x_ref, w_ref, o_ref, *, num_heads, d_kq, d_v, scale):
    # x_ref: (S, d_in)
    # w_ref: (d_in, H*d_kq + H*d_kq + H*d_v)   packed [Wq | Wk | Wv], heads on lanes
    # o_ref: (S, H*d_v)                         lane-dense output slab
    x = x_ref[...]

    # ONE fused projection matmul for Q, K and V of all heads.
    proj = jnp.dot(x, w_ref[...], preferred_element_type=jnp.float32)  # (S, 2*H*d_kq + H*d_v)

    hq = num_heads * d_kq
    # Fold the softmax temperature into the (small) queries instead of scaling
    # every (S, S) score matrix.
    q_all = proj[:, :hq] * jnp.float32(scale)       # (S, H*d_kq), f32
    k_all = proj[:, hq:2 * hq]                      # (S, H*d_kq), f32
    v_all = proj[:, 2 * hq:]                        # (S, H*d_v),  f32

    # Static unroll over heads; fine at H=4.
    # TODO(synk): switch to lax.fori_loop(..., unroll=True) or a grid axis if H
    # grows enough for vreg pressure / spills to matter.
    outs = []
    for h in range(num_heads):
        q_h = q_all[:, h * d_kq:(h + 1) * d_kq]     # (S, d_kq)
        k_h = k_all[:, h * d_kq:(h + 1) * d_kq]     # (S, d_kq)
        v_h = v_all[:, h * d_v:(h + 1) * d_v]       # (S, d_v)

        # scores = Q @ K^T (rhs-transposed contraction, MXU-native).  This is
        # the transpose of torch's K @ Q^T, so torch's softmax(dim=0) becomes
        # softmax over the last axis and W^T @ V becomes a plain W @ V below.
        scores = lax.dot_general(
            q_h, k_h, (((1,), (1,)), ((), ())),
            preferred_element_type=jnp.float32)     # (S, S), f32

        m = jnp.max(scores, axis=-1, keepdims=True)
        e = jnp.exp(scores - m)
        denom = jnp.sum(e, axis=-1, keepdims=True)
        w = e * pl.reciprocal(denom, approx=True)   # EUP vrcp + VPU mul

        outs.append(jnp.dot(w, v_h, preferred_element_type=jnp.float32))  # (S, d_v)

    # Single unmasked, lane-dense store: (S, H*d_v) with H*d_v == 128.
    o_ref[...] = jnp.concatenate(outs, axis=1).astype(o_ref.dtype)


def pack_mha_weights(W_query, W_key, W_value, dtype=jnp.float32):
    """Pack per-head weights (H, d_in, d) into one (d_in, 2*H*d_kq + H*d_v) matrix.

    Do this ONCE at model init when weights are static — it is pure layout
    plumbing (transpose + reshape + concat + optional bf16 cast) and should not
    sit on the per-call hot path of an inference loop.
    """
    d_in = W_query.shape[1]

    def pack(w):  # (H, d_in, d) -> (d_in, H*d): heads packed along the lane axis
        return jnp.transpose(w, (1, 0, 2)).reshape(d_in, -1)

    w_all = jnp.concatenate([pack(W_query), pack(W_key), pack(W_value)], axis=1)
    return w_all.astype(dtype)


def multi_head_attention_packed(x, w_all, *, num_heads, d_out_kq, d_out_v):
    """x: (S, d_in); w_all: packed weights from pack_mha_weights().
    Returns (H, S, d_out_v) f32, identical to torch cat(dim=0).reshape(-1, S, d_in)."""
    S, d_in = x.shape
    H, d_kq, d_v = num_heads, d_out_kq, d_out_v
    total = 2 * H * d_kq + H * d_v
    assert w_all.shape == (d_in, total), (w_all.shape, (d_in, total))
    # torch's final reshape(-1, S, d_in) is only well-formed when d_out_v == d_in.
    assert d_v == d_in, "MultiHeadAttention reshape requires d_out_v == d_in"

    kernel = functools.partial(
        _mha_fused_kernel, num_heads=H, d_kq=d_kq, d_v=d_v,
        scale=1.0 / math.sqrt(d_out_kq))

    out = pl.pallas_call(
        kernel,
        out_shape=jax.ShapeDtypeStruct((S, H * d_v), jnp.float32),
        grid_spec=pltpu.PrefetchScalarGridSpec(
            num_scalar_prefetch=0,
            grid=(1,),  # single invocation: heads live in the lane dimension
            in_specs=[
                pl.BlockSpec((S, d_in), lambda i: (0, 0)),
                pl.BlockSpec((d_in, total), lambda i: (0, 0)),
            ],
            out_specs=pl.BlockSpec((S, H * d_v), lambda i: (0, 0)),
        ),
        compiler_params=pltpu.CompilerParams(
            # TODO(synk): flash rewrite -> query-block axis marked "parallel"
            # so v7x megacore shards it; pointless at this latency-bound size.
            dimension_semantics=("arbitrary",)),
    )(x, w_all)

    # Lanes pack heads outermost within the H*d_v slab: (S, H*d_v) -> (H, S, d_v).
    return jnp.transpose(out.reshape(S, H, d_v), (1, 0, 2))


def multi_head_attention(x, W_query, W_key, W_value, d_out_kq,
                         *, compute_dtype=jnp.float32):
    """Convenience wrapper that packs weights per call (use pack_mha_weights +
    multi_head_attention_packed directly for an inference loop with static weights).

    compute_dtype=jnp.bfloat16 casts only the MXU operands (x, weights); the
    softmax and all accumulations stay in f32."""
    H, d_in, d_kq = W_query.shape
    d_v = W_value.shape[-1]
    w_all = pack_mha_weights(W_query, W_key, W_value, dtype=compute_dtype)
    return multi_head_attention_packed(
        x.astype(compute_dtype), w_all,
        num_heads=H, d_out_kq=d_kq, d_out_v=d_v)


def _reference(x, W_query, W_key, W_value, d_out_kq):
    """Pure-JAX transcription of the PyTorch forward, for verification.
    Uses HIGHEST matmul precision so the f32 reference is a real f32 reference
    (XLA's DEFAULT precision may use lossy bf16 passes for f32 dots on TPU)."""
    hp = jax.lax.Precision.HIGHEST
    outs = []
    for h in range(W_query.shape[0]):
        keys = jnp.dot(x, W_key[h], precision=hp, preferred_element_type=jnp.float32)
        queries = jnp.dot(x, W_query[h], precision=hp, preferred_element_type=jnp.float32)
        values = jnp.dot(x, W_value[h], precision=hp, preferred_element_type=jnp.float32)
        scores = jnp.dot(keys, queries.T, precision=hp)
        w = jax.nn.softmax(scores / jnp.sqrt(jnp.float32(d_out_kq)), axis=0)
        outs.append(jnp.dot(w.T, values, precision=hp))
    cat = jnp.concatenate(outs, axis=0)
    return cat.reshape(-1, x.shape[0], x.shape[-1])


if __name__ == "__main__":
    # Small shapes consistent with the module's forward:
    # x: (seq, d_in); d_out_v == d_in so torch's reshape is well-formed.
    seq, d_in, d_out_kq, d_out_v, num_heads = 8, 32, 16, 32, 4

    key = jax.random.PRNGKey(0)
    kx, kq, kk, kv = jax.random.split(key, 4)

    x = jax.random.normal(kx, (seq, d_in), dtype=jnp.float32)
    # torch.rand -> uniform [0, 1)
    W_query = jax.random.uniform(kq, (num_heads, d_in, d_out_kq), dtype=jnp.float32)
    W_key = jax.random.uniform(kk, (num_heads, d_in, d_out_kq), dtype=jnp.float32)
    W_value = jax.random.uniform(kv, (num_heads, d_in, d_out_v), dtype=jnp.float32)

    # --- f32 path: matches the PyTorch module's numerics. -------------------
    out = multi_head_attention(x, W_query, W_key, W_value, d_out_kq)
    out = jax.block_until_ready(out)

    ref = _reference(x, W_query, W_key, W_value, d_out_kq)
    assert out.shape == ref.shape, (out.shape, ref.shape)
    # Tolerance covers the EUP approximate reciprocal (~2^-12 relative) used in
    # the softmax denominator.
    np.testing.assert_allclose(np.asarray(out), np.asarray(ref), rtol=5e-3, atol=5e-3)

    # --- bf16-operand path (v6e/v7x fast MXU path; softmax stays in f32). ----
    out_bf16 = multi_head_attention(x, W_query, W_key, W_value, d_out_kq,
                                    compute_dtype=jnp.bfloat16)
    out_bf16 = jax.block_until_ready(out_bf16)
    ref_bf16 = _reference(x.astype(jnp.bfloat16),
                          W_query.astype(jnp.bfloat16),
                          W_key.astype(jnp.bfloat16),
                          W_value.astype(jnp.bfloat16),
                          d_out_kq)
    np.testing.assert_allclose(np.asarray(out_bf16), np.asarray(ref_bf16),
                               rtol=2e-2, atol=2e-2)

    print("KERNEL_OK")
</pallas_src>

<mosaic_0001>
module attributes {stable_mosaic.version = 11 : i64} {
  func.func @_mha_fused_kernel(%arg0: i32, %arg1: memref<8x32xf32, #tpu.memory_space<vmem>>, %arg2: memref<32x256xf32, #tpu.memory_space<vmem>>, %arg3: memref<8x128xf32, #tpu.memory_space<vmem>>) attributes {dimension_semantics = [#tpu.dimension_semantics<arbitrary>], iteration_bounds = array<i64: 1>, scalar_prefetch = 0 : i64, scratch_operands = 0 : i64, tpu.core_type = #tpu.core_type<tc>, window_params = [{pipeline_mode = #tpu.pipeline_mode<synchronous>, transform_indices = @transform_0, window_bounds = array<i64: 8, 32>}, {pipeline_mode = #tpu.pipeline_mode<synchronous>, transform_indices = @transform_1, window_bounds = array<i64: 32, 256>}, {pipeline_mode = #tpu.pipeline_mode<synchronous>, transform_indices = @transform_2, window_bounds = array<i64: 8, 128>}]} {
    %c0 = arith.constant 0 : index
    %c0_0 = arith.constant 0 : index
    %0 = vector.load %arg1[%c0, %c0_0] : memref<8x32xf32, #tpu.memory_space<vmem>>, vector<8x32xf32>
    %c0_1 = arith.constant 0 : index
    %c0_2 = arith.constant 0 : index
    %1 = vector.load %arg2[%c0_1, %c0_2] : memref<32x256xf32, #tpu.memory_space<vmem>>, vector<32x256xf32>
    %cst = arith.constant dense<0.000000e+00> : vector<8x256xf32>
    %2 = tpu.matmul %0, %1, %cst {dimension_numbers = #tpu.dot_dimension_numbers<[1], [0], [0], [1], [0, 0, 1, 1], [], []>} : vector<8x32xf32>, vector<32x256xf32>, vector<8x256xf32> -> vector<8x256xf32>
    %3 = vector.extract_strided_slice %2 {offsets = [0, 0], sizes = [8, 64], strides = [1, 1]} : vector<8x256xf32> to vector<8x64xf32>
    %cst_3 = arith.constant 2.500000e-01 : f32
    %4 = vector.broadcast %cst_3 : f32 to vector<8x64xf32>
    %5 = arith.mulf %3, %4 : vector<8x64xf32>
    %6 = vector.extract_strided_slice %2 {offsets = [0, 64], sizes = [8, 64], strides = [1, 1]} : vector<8x256xf32> to vector<8x64xf32>
    %7 = vector.extract_strided_slice %2 {offsets = [0, 128], sizes = [8, 128], strides = [1, 1]} : vector<8x256xf32> to vector<8x128xf32>
    %8 = vector.extract_strided_slice %5 {offsets = [0, 0], sizes = [8, 16], strides = [1, 1]} : vector<8x64xf32> to vector<8x16xf32>
    %9 = vector.extract_strided_slice %6 {offsets = [0, 0], sizes = [8, 16], strides = [1, 1]} : vector<8x64xf32> to vector<8x16xf32>
    %10 = vector.extract_strided_slice %7 {offsets = [0, 0], sizes = [8, 32], strides = [1, 1]} : vector<8x128xf32> to vector<8x32xf32>
    %cst_4 = arith.constant dense<0.000000e+00> : vector<8x8xf32>
    %11 = tpu.matmul %8, %9, %cst_4 {dimension_numbers = #tpu.dot_dimension_numbers<[1], [1], [0], [0], [0, 0, 1, 0], [], []>} : vector<8x16xf32>, vector<8x16xf32>, vector<8x8xf32> -> vector<8x8xf32>
    %cst_5 = arith.constant dense<0xFF800000> : vector<8xf32>
    %12 = vector.multi_reduction <maximumf>, %11, %cst_5 [1] : vector<8x8xf32> to vector<8xf32>
    %13 = vector.shape_cast %12 : vector<8xf32> to vector<8x1xf32>
    %14 = vector.broadcast %13 : vector<8x1xf32> to vector<8x8xf32>
    %15 = arith.subf %11, %14 : vector<8x8xf32>
    %16 = math.exp %15 : vector<8x8xf32>
    %cst_6 = arith.constant dense<0.000000e+00> : vector<8xf32>
    %17 = vector.multi_reduction <add>, %16, %cst_6 [1] : vector<8x8xf32> to vector<8xf32>
    %18 = vector.shape_cast %17 : vector<8xf32> to vector<8x1xf32>
    %19 = tpu.reciprocal %18 {approx = true} : vector<8x1xf32> -> vector<8x1xf32>
    %20 = vector.broadcast %19 : vector<8x1xf32> to vector<8x8xf32>
    %21 = arith.mulf %16, %20 : vector<8x8xf32>
    %cst_7 = arith.constant dense<0.000000e+00> : vector<8x32xf32>
    %22 = tpu.matmul %21, %10, %cst_7 {dimension_numbers = #tpu.dot_dimension_numbers<[1], [0], [0], [1], [0, 0, 1, 1], [], []>} : vector<8x8xf32>, vector<8x32xf32>, vector<8x32xf32> -> vector<8x32xf32>
    %23 = vector.extract_strided_slice %5 {offsets = [0, 16], sizes = [8, 16], strides = [1, 1]} : vector<8x64xf32> to vector<8x16xf32>
    %24 = vector.extract_strided_slice %6 {offsets = [0, 16], sizes = [8, 16], strides = [1, 1]} : vector<8x64xf32> to vector<8x16xf32>
    %25 = vector.extract_strided_slice %7 {offsets = [0, 32], sizes = [8, 32], strides = [1, 1]} : vector<8x128xf32> to vector<8x32xf32>
    %cst_8 = arith.constant dense<0.000000e+00> : vector<8x8xf32>
    %26 = tpu.matmul %23, %24, %cst_8 {dimension_numbers = #tpu.dot_dimension_numbers<[1], [1], [0], [0], [0, 0, 1, 0], [], []>} : vector<8x16xf32>, vector<8x16xf32>, vector<8x8xf32> -> vector<8x8xf32>
    %cst_9 = arith.constant dense<0xFF800000> : vector<8xf32>
    %27 = vector.multi_reduction <maximumf>, %26, %cst_9 [1] : vector<8x8xf32> to vector<8xf32>
    %28 = vector.shape_cast %27 : vector<8xf32> to vector<8x1xf32>
    %29 = vector.broadcast %28 : vector<8x1xf32> to vector<8x8xf32>
    %30 = arith.subf %26, %29 : vector<8x8xf32>
    %31 = math.exp %30 : vector<8x8xf32>
    %cst_10 = arith.constant dense<0.000000e+00> : vector<8xf32>
    %32 = vector.multi_reduction <add>, %31, %cst_10 [1] : vector<8x8xf32> to vector<8xf32>
    %33 = vector.shape_cast %32 : vector<8xf32> to vector<8x1xf32>
    %34 = tpu.reciprocal %33 {approx = true} : vector<8x1xf32> -> vector<8x1xf32>
    %35 = vector.broadcast %34 : vector<8x1xf32> to vector<8x8xf32>
    %36 = arith.mulf %31, %35 : vector<8x8xf32>
    %cst_11 = arith.constant dense<0.000000e+00> : vector<8x32xf32>
    %37 = tpu.matmul %36, %25, %cst_11 {dimension_numbers = #tpu.dot_dimension_numbers<[1], [0], [0], [1], [0, 0, 1, 1], [], []>} : vector<8x8xf32>, vector<8x32xf32>, vector<8x32xf32> -> vector<8x32xf32>
    %38 = vector.extract_strided_slice %5 {offsets = [0, 32], sizes = [8, 16], strides = [1, 1]} : vector<8x64xf32> to vector<8x16xf32>
    %39 = vector.extract_strided_slice %6 {offsets = [0, 32], sizes = [8, 16], strides = [1, 1]} : vector<8x64xf32> to vector<8x16xf32>
    %40 = vector.extract_strided_slice %7 {offsets = [0, 64], sizes = [8, 32], strides = [1, 1]} : vector<8x128xf32> to vector<8x32xf32>
    %cst_12 = arith.constant dense<0.000000e+00> : vector<8x8xf32>
    %41 = tpu.matmul %38, %39, %cst_12 {dimension_numbers = #tpu.dot_dimension_numbers<[1], [1], [0], [0], [0, 0, 1, 0], [], []>} : vector<8x16xf32>, vector<8x16xf32>, vector<8x8xf32> -> vector<8x8xf32>
    %cst_13 = arith.constant dense<0xFF800000> : vector<8xf32>
    %42 = vector.multi_reduction <maximumf>, %41, %cst_13 [1] : vector<8x8xf32> to vector<8xf32>
    %43 = vector.shape_cast %42 : vector<8xf32> to vector<8x1xf32>
    %44 = vector.broadcast %43 : vector<8x1xf32> to vector<8x8xf32>
    %45 = arith.subf %41, %44 : vector<8x8xf32>
    %46 = math.exp %45 : vector<8x8xf32>
    %cst_14 = arith.constant dense<0.000000e+00> : vector<8xf32>
    %47 = vector.multi_reduction <add>, %46, %cst_14 [1] : vector<8x8xf32> to vector<8xf32>
    %48 = vector.shape_cast %47 : vector<8xf32> to vector<8x1xf32>
    %49 = tpu.reciprocal %48 {approx = true} : vector<8x1xf32> -> vector<8x1xf32>
    %50 = vector.broadcast %49 : vector<8x1xf32> to vector<8x8xf32>
    %51 = arith.mulf %46, %50 : vector<8x8xf32>
    %cst_15 = arith.constant dense<0.000000e+00> : vector<8x32xf32>
    %52 = tpu.matmul %51, %40, %cst_15 {dimension_numbers = #tpu.dot_dimension_numbers<[1], [0], [0], [1], [0, 0, 1, 1], [], []>} : vector<8x8xf32>, vector<8x32xf32>, vector<8x32xf32> -> vector<8x32xf32>
    %53 = vector.extract_strided_slice %5 {offsets = [0, 48], sizes = [8, 16], strides = [1, 1]} : vector<8x64xf32> to vector<8x16xf32>
    %54 = vector.extract_strided_slice %6 {offsets = [0, 48], sizes = [8, 16], strides = [1, 1]} : vector<8x64xf32> to vector<8x16xf32>
    %55 = vector.extract_strided_slice %7 {offsets = [0, 96], sizes = [8, 32], strides = [1, 1]} : vector<8x128xf32> to vector<8x32xf32>
    %cst_16 = arith.constant dense<0.000000e+00> : vector<8x8xf32>
    %56 = tpu.matmul %53, %54, %cst_16 {dimension_numbers = #tpu.dot_dimension_numbers<[1], [1], [0], [0], [0, 0, 1, 0], [], []>} : vector<8x16xf32>, vector<8x16xf32>, vector<8x8xf32> -> vector<8x8xf32>
    %cst_17 = arith.constant dense<0xFF800000> : vector<8xf32>
    %57 = vector.multi_reduction <maximumf>, %56, %cst_17 [1] : vector<8x8xf32> to vector<8xf32>
    %58 = vector.shape_cast %57 : vector<8xf32> to vector<8x1xf32>
    %59 = vector.broadcast %58 : vector<8x1xf32> to vector<8x8xf32>
    %60 = arith.subf %56, %59 : vector<8x8xf32>
    %61 = math.exp %60 : vector<8x8xf32>
    %cst_18 = arith.constant dense<0.000000e+00> : vector<8xf32>
    %62 = vector.multi_reduction <add>, %61, %cst_18 [1] : vector<8x8xf32> to vector<8xf32>
    %63 = vector.shape_cast %62 : vector<8xf32> to vector<8x1xf32>
    %64 = tpu.reciprocal %63 {approx = true} : vector<8x1xf32> -> vector<8x1xf32>
    %65 = vector.broadcast %64 : vector<8x1xf32> to vector<8x8xf32>
    %66 = arith.mulf %61, %65 : vector<8x8xf32>
    %cst_19 = arith.constant dense<0.000000e+00> : vector<8x32xf32>
    %67 = tpu.matmul %66, %55, %cst_19 {dimension_numbers = #tpu.dot_dimension_numbers<[1], [0], [0], [1], [0, 0, 1, 1], [], []>} : vector<8x8xf32>, vector<8x32xf32>, vector<8x32xf32> -> vector<8x32xf32>
    %68 = tpu.concatenate %22, %37, %52, %67 in 1 : vector<8x32xf32>, vector<8x32xf32>, vector<8x32xf32>, vector<8x32xf32> -> vector<8x128xf32>
    %c0_20 = arith.constant 0 : index
    %c0_21 = arith.constant 0 : index
    %69 = vector.load %arg3[%c0_20, %c0_21] : memref<8x128xf32, #tpu.memory_space<vmem>>, vector<8x128xf32>
    tpu.vector_store %arg3[%c0_20, %c0_21], %68 {strides = array<i32>} : memref<8x128xf32, #tpu.memory_space<vmem>>, vector<8x128xf32>,
    return
  }
  func.func @transform_0(%arg0: i32) -> (i32, i32) {
    %c0_i32 = arith.constant 0 : i32
    %c0_i32_0 = arith.constant 0 : i32
    %c0_i32_1 = arith.constant 0 : i32
    return %c0_i32, %c0_i32_0 : i32, i32
  }
  func.func @transform_1(%arg0: i32) -> (i32, i32) {
    %c0_i32 = arith.constant 0 : i32
    %c0_i32_0 = arith.constant 0 : i32
    %c0_i32_1 = arith.constant 0 : i32
    return %c0_i32, %c0_i32_0 : i32, i32
  }
  func.func @transform_2(%arg0: i32) -> (i32, i32) {
    %c0_i32 = arith.constant 0 : i32
    %c0_i32_0 = arith.constant 0 : i32
    %c0_i32_1 = arith.constant 0 : i32
    return %c0_i32, %c0_i32_0 : i32, i32
  }
}

</mosaic_0001>

<bundles_post_ra>
// kernel: tpu_custom_call.1
= control target key start
LH: loop header
LB: loop body
LE: loop exit
PB: predicated region body
PF: predicated region fallthrough
CT: control target
= control target key end

     0   :  { %7 = vsyncpa [#allocation3], 0  ;;  %s1130_s0 = inlined_call_operand.hbm [shape: f32[8,32], index: 0, kind: input, shape index: {}]   ;;  %s1131_s1 = inlined_call_operand.hbm [shape: f32[32,256], index: 1, kind: input, shape index: {}]   ;;  %s1132_s2 = inlined_call_operand.hbm [shape: f32[8,128], index: 2, kind: output, shape index: {}]  }
   0x1   :  { %8 = vsyncpa [#allocation6], 0 }
   0x2   :  { %9 = vsyncpa [#allocation4], 0  ;;  %s995_s9 = smov [#allocation2]   ;;  %s996_s11 = smov [#allocation5]  }
   0x3   :  { %s16_s10 = sshll.u32 %s995_s9, 4  ;;  %s25_s12 = sshll.u32 %s996_s11, 4  ;;  %s17_s10 = int_to_ptr.vmem [resolvable:$true] %s16_s10  ;;  %s1023_s12 = int_to_ptr.vmem [resolvable:$true] %s25_s12 }
   0x4   :  { %s923_s15 = scalar_lea.hbm %s1130_s0, 128 }
   0x5   :  { %p924_p0 = scmp.ne.s32.totalorder %s1130_s0, %s923_s15  ;;  %p927_p1 = scmp.lt.u32.totalorder %s923_s15, %s1130_s0 }
   0x7   :  { %p929_p2 = pnand %p927_p1, %p924_p0 }
   0x9   :  { %932 = shalt.err (!%p929_p2)
}
   0xa   :  { %s933_s20 = scalar_lea.vmem %s17_s10, 128  ;;  %p938_p4 = scmp.lt.s32.totalorder %s17_s10, %s17_s10 }
   0xb   :  { %p934_p3 = scmp.ne.s32.totalorder %s17_s10, %s933_s20  ;;  %p939_p5 = scmp.lt.s32.totalorder %s933_s20, %s933_s20 }
   0xd   :  { %p940_p6 = por %p939_p5, %p938_p4 }
   0xf   :  { %p941_p7 = pnand %p940_p6, %p934_p3 }
  0x11   :  { %944 = shalt.err (!%p941_p7)
}
  0x12   :  { %19 = dma.hbm_to_vmem [thread:$0]  %s1130_s0, 128, %s17_s10, [#allocation3]  }
  0x13   :  { %s945_s25 = scalar_lea.hbm %s1131_s1, 1024 }
  0x14   :  { %p946_p8 = scmp.ne.s32.totalorder %s1131_s1, %s945_s25  ;;  %p949_p9 = scmp.lt.u32.totalorder %s945_s25, %s1131_s1 }
  0x16   :  { %p951_p10 = pnand %p949_p9, %p946_p8 }
  0x18   :  { %954 = shalt.err (!%p951_p10)
}
  0x19   :  { %s955_s30 = scalar_lea.vmem %s1023_s12, 1024  ;;  %p960_p12 = scmp.lt.s32.totalorder %s1023_s12, %s1023_s12 }
  0x1a   :  { %p956_p11 = scmp.ne.s32.totalorder %s1023_s12, %s955_s30  ;;  %p961_p13 = scmp.lt.s32.totalorder %s955_s30, %s955_s30 }
  0x1c   :  { %p962_p0 = por %p961_p13, %p960_p12 }
  0x1e   :  { %p963_p1 = pnand %p962_p0, %p956_p11 }
  0x20   :  { %966 = shalt.err (!%p963_p1)
}
  0x21   :  { %s997_s0 = smov 256   ;;  %s998_s3 = smov 16  }
  0x22   :  { %31 = dma.hbm_to_vmem [thread:$0]  %s1131_s1, 1024, %s1023_s12, [#allocation6], %s997_s0, %s997_s0, %s998_s3  }
  0x23   :  { %989 = dma.done.wait [#allocation3], 128  }
  0x24   :  { %990 = vsyncadd [#allocation3], 4294967168 }
  0x25   :  { %991 = dma.done.wait [#allocation6], 1024  }
  0x26   :  { %992 = vsyncadd [#allocation6], 4294966272  ;;  %v999_v0 = vmov 0.0   ;;  %v40_v1 = vld [vmem:[#allocation5 + $0x8] sm:$0xff]  ;;  %v42_v2 = vld [vmem:[#allocation5 + $0x18] sm:$0xff]  ;;  %vm47_vm0 = vcmask 261120  }
  0x27   :  { %115 = vmatprep.mubr.f32.mxu0 %v999_v0  ;;  %846 = vmatprep.subr.mxu1 %v999_v0  ;;  %v39_v3 = vld [vmem:[#allocation5] sm:$0xff]  ;;  %v886_v4 = vpack.c.bf16 %v42_v2, %v40_v1  ;;  %v41_v5 = vld [vmem:[#allocation5 + $0x10] sm:$0xff]  ;;  %v44_v6 = vld [vmem:[#allocation5 + $0x28] sm:$0xff]  ;;  %vm1000_vm1 = vmmov 0   ;;  %s1001_s1 = smov 64   ;;  %s1002_s6 = smov 112  }
  0x28   :  { %v46_v7 = vld [vmem:[#allocation5 + $0x38] sm:$0xff]  ;;  %v888_v8 = vpack.c.bf16 %v41_v5, %v39_v3  ;;  %v43_v10 = vld [vmem:[#allocation5 + $0x20] sm:$0xff]  ;;  %v45_v11 = vld [vmem:[#allocation5 + $0x30] sm:$0xff]  ;;  %848 = vmatprep.mubr.msk.f32.mxu1 %vm1000_vm1, %v999_v0  ;;  %s1003_s7 = smov 48   ;;  %s1004_s8 = smov 32   ;;  %vm126_vm2 = vcmask 130048  }
  0x29   :  { %v890_v9 = vpack.c.bf16 %v46_v7, %v44_v6  ;;  %887 = vmatprep.subr.bf16.mxu0 %v886_v4  ;;  %v892_v12 = vpack.c.bf16 %v45_v11, %v43_v10  ;;  %v38_v13 = vld [vmem:[#allocation2] sm:$0xff]  ;;  %s1005_s9 = smov 96   ;;  %s1006_s10 = smov 80   ;;  %vm202_vm3 = vcmask 64512   ;;  %vm796_vm4 = vcmask 523264  }
  0x2a   :  { %889 = vmatpush1.bf16.msra.mxu0 %v888_v8  ;;  %s1007_s11 = smov [#allocation7]   ;;  %vm798_vm5 = vcmask 785408  }
  0x2b   :  { %891 = vmatprep.subr.bf16.mxu0 %v890_v9  ;;  %s807_s12 = sshll.u32 %s1007_s11, 4  ;;  %s808_s12 = int_to_ptr.vmem [resolvable:$true] %s807_s12 }
  0x2c   :  { %s967_s13 = scalar_lea.vmem %s808_s12, 128  ;;  %p972_p3 = scmp.lt.s32.totalorder %s808_s12, %s808_s12 }
  0x2d   :  { %p968_p2 = scmp.ne.s32.totalorder %s808_s12, %s967_s13  ;;  %p973_p4 = scmp.lt.s32.totalorder %s967_s13, %s967_s13 }
  0x2e   :  { %893 = vmatpush1.bf16.msra.mxu0 %v892_v12 }
  0x2f   :  { %856 = vmatprep.subr.mxu0 %v999_v0  ;;  %p974_p5 = por %p973_p4, %p972_p3 }
  0x31   :  { %817 = vmatmul.mubr.msk.f32.vlgmr.msra.gmra.mrb[0].mxu0 %vm47_vm0, %v38_v13  ;;  %p975_p6 = pnand %p974_p5, %p968_p2 }
  0x32   :  { %858 = vmatprep.mubr.msk.f32.mxu0 %vm1000_vm1, %v999_v0 }
 0x104   :  { %v117_v14 = vpop.f32.mrb[0].mxu0 }
 0x105   :  { %124 = vrot.lane.b32.xlu0 %v117_v14, %s1001_s1  ;;  %v1064_v15 = vpop.f32.mrb[1].mxu0  ;;  %v122_v16 = vmul.f32 0.25, %v117_v14 }
 0x107   :  { %287 = vrot.lane.b32.xlu1 %v122_v16, %s1002_s6 }
 0x109   :  { %289 = vrot.lane.b32.xlu0 %v117_v14, %s1003_s7 }
 0x10b   :  { %455 = vrot.lane.b32.xlu1 %v117_v14, %s1004_s8 }
 0x10d   :  { %453 = vrot.lane.b32.xlu0 %v122_v16, %s1005_s9 }
 0x10f   :  { %620 = vrot.lane.b32.xlu1 %v117_v14, %s998_s3 }
 0x111   :  { %618 = vrot.lane.b32.xlu0 %v122_v16, %s1006_s10 }
 0x177   :  { %v125_v17 = vpop.permute.xlu0 %124 }
 0x178   :  { %847 = vmatpush3.xpose.msk.msra.mxu1 %vm126_vm2, %v125_v17 }
 0x179   :  { %v288_v18 = vpop.permute.xlu1 %287  ;;  %851 = vmatprep.subr.mxu1 %v999_v0 }
 0x17b   :  { %v290_v19 = vpop.permute.xlu0 %289  ;;  %849 = vmatmul.mubr.msk.f32.vlgmr.msra.gmra.mrb[0].mxu1 %vm126_vm2, %v122_v16 }
 0x17c   :  { %852 = vmatpush3.msra.mxu1 %v1064_v15  ;;  %857 = vmatpush3.xpose.msk.msra.mxu0 %vm126_vm2, %v290_v19 }
 0x17d   :  { %v456_v20 = vpop.permute.xlu1 %455  ;;  %866 = vmatprep.subr.mxu0 %v999_v0  ;;  %853 = vmatprep.mubr.msk.f32.mxu1 %vm1000_vm1, %v999_v0 }
 0x17e   :  { %861 = vmatprep.subr.mxu1 %v999_v0 }
 0x17f   :  { %859 = vmatmul.mubr.msk.f32.vlgmr.msra.gmra.mrb[2].mxu0 %vm126_vm2, %v288_v18  ;;  %v454_v21 = vpop.permute.xlu0 %453 }
 0x180   :  { %867 = vmatpush3.xpose.msk.msra.mxu0 %vm126_vm2, %v456_v20  ;;  %868 = vmatprep.mubr.msk.f32.mxu0 %vm1000_vm1, %v999_v0 }
 0x181   :  { %876 = vmatprep.subr.mxu0 %v999_v0  ;;  %v621_v22 = vpop.permute.xlu1 %620 }
 0x183   :  { %869 = vmatmul.mubr.msk.f32.vlgmr.msra.gmra.mrb[4].mxu0 %vm126_vm2, %v454_v21  ;;  %v619_v23 = vpop.permute.xlu0 %618 }
 0x184   :  { %877 = vmatpush3.xpose.msk.msra.mxu0 %vm126_vm2, %v621_v22  ;;  %878 = vmatprep.mubr.msk.f32.mxu0 %vm1000_vm1, %v999_v0 }
 0x187   :  { %879 = vmatmul.mubr.msk.f32.vlgmr.msra.gmra.mrb[6].mxu0 %vm126_vm2, %v619_v23 }
 0x24e   :  { %v198_v24 = vpop.f32.mrb[0].mxu1 }
 0x24f   :  { %v850_v25 = vpop.f32.mrb[1].mxu1  ;;  %v203_v26 = vsel %vm202_vm3, %v198_v24, -inf }
 0x250   :  { %204 = vmax.xlane.f32.xlu1 %v203_v26 }
 0x252   :  { %v361_v27 = vpop.f32.mrb[2].mxu0 }
 0x253   :  { %v860_v28 = vpop.f32.mrb[3].mxu0  ;;  %v365_v29 = vsel %vm202_vm3, %v361_v27, -inf }
 0x254   :  { %366 = vmax.xlane.f32.xlu0 %v365_v29 }
 0x256   :  { %v527_v30 = vpop.f32.mrb[4].mxu0 }
 0x257   :  { %v870_v31 = vpop.f32.mrb[5].mxu0  ;;  %v531_v32 = vsel %vm202_vm3, %v527_v30, -inf }
 0x258   :  { %532 = vmax.xlane.f32.xlu0 %v531_v32 }
 0x25a   :  { %v692_v33 = vpop.f32.mrb[6].mxu0 }
 0x25b   :  { %v880_v34 = vpop.f32.mrb[7].mxu0  ;;  %v696_v35 = vsel %vm202_vm3, %v692_v33, -inf }
 0x25c   :  { %697 = vmax.xlane.f32.xlu1 %v696_v35 }
 0x2dd   :  { %v205_v36 = vpop.xlane.xlu1 %204 }
 0x2de   :  { %v206_v37 = vsub.f32 %v198_v24, %v205_v36 }
 0x2e0   :  { %v207_v38 = vmul.f32 1.442695, %v206_v37 }
 0x2e1   :  { %v367_v39 = vpop.xlane.xlu0 %366 }
 0x2e2   :  { %907 = vpow2.f32 %v207_v38  ;;  %v368_v40 = vsub.f32 %v361_v27, %v367_v39 }
 0x2e4   :  { %v369_v41 = vmul.f32 1.442695, %v368_v40 }
 0x2e5   :  { %v533_v42 = vpop.xlane.xlu0 %532 }
 0x2e6   :  { %909 = vpow2.f32 %v369_v41  ;;  %v534_v43 = vsub.f32 %v527_v30, %v533_v42 }
 0x2e8   :  { %v535_v44 = vmul.f32 1.442695, %v534_v43 }
 0x2e9   :  { %v698_v51 = vpop.xlane.xlu1 %697 }
 0x2ea   :  { %911 = vpow2.f32 %v535_v44  ;;  %v699_v52 = vsub.f32 %v692_v33, %v698_v51 }
 0x2ec   :  { %v908_v45 = vpop.eup %907  ;;  %v700_v53 = vmul.f32 1.442695, %v699_v52 }
 0x2ed   :  { %v209_v46 = vsel %vm202_vm3, %v908_v45, 0.0 }
 0x2ee   :  { %210 = vadd.xlane.f32.xlu0 %v209_v46  ;;  %913 = vpow2.f32 %v700_v53 }
 0x2f0   :  { %v910_v47 = vpop.eup %909 }
 0x2f1   :  { %v371_v48 = vsel %vm202_vm3, %v910_v47, 0.0 }
 0x2f2   :  { %372 = vadd.xlane.f32.xlu1 %v371_v48 }
 0x2f4   :  { %v912_v49 = vpop.eup %911 }
 0x2f5   :  { %v537_v50 = vsel %vm202_vm3, %v912_v49, 0.0 }
 0x2f6   :  { %538 = vadd.xlane.f32.xlu0 %v537_v50 }
 0x2f8   :  { %v914_v54 = vpop.eup %913 }
 0x2f9   :  { %v702_v55 = vsel %vm202_vm3, %v914_v54, 0.0 }
 0x303   :  { %542 = vrot.lane.b32.xlu1 %v1064_v15, %s1001_s1 }
 0x30c   :  { %377 = vrot.lane.b32.xlu0 %v1064_v15, %s1005_s9 }
 0x327   :  { %703 = vadd.xlane.f32.xlu1 %v702_v55 }
 0x338   :  { %707 = vrot.lane.b32.xlu1 %v1064_v15, %s1004_s8 }
 0x37b   :  { %v211_v56 = vpop.xlane.xlu0 %210 }
 0x37c   :  { %915 = vrcp.f32 %v211_v56 }
 0x37f   :  { %v373_v57 = vpop.xlane.xlu1 %372 }
 0x380   :  { %917 = vrcp.f32 %v373_v57 }
 0x383   :  { %v539_v58 = vpop.xlane.xlu0 %538  ;;  %v543_v1 = vpop.permute.xlu1 %542 }
 0x384   :  { %919 = vrcp.f32 %v539_v58 }
 0x386   :  { %v916_v59 = vpop.eup %915 }
 0x387   :  { %v213_v60 = vmul.f32 %v916_v59, %v908_v45  ;;  %v378_v61 = vpop.permute.xlu0 %377 }
 0x389   :  { %854 = vmatmul.mubr.msk.f32.vlgmr.msra.gmra.mrb[2].mxu1 %vm202_vm3, %v213_v60 }
 0x38a   :  { %v918_v62 = vpop.eup %917  ;;  %862 = vmatpush3.msra.mxu1 %v378_v61  ;;  %863 = vmatprep.mubr.msk.f32.mxu1 %vm1000_vm1, %v999_v0 }
 0x38b   :  { %v375_v63 = vmul.f32 %v918_v62, %v910_v47  ;;  %871 = vmatprep.subr.mxu1 %v999_v0 }
 0x38d   :  { %864 = vmatmul.mubr.msk.f32.vlgmr.msra.gmra.mrb[4].mxu1 %vm202_vm3, %v375_v63 }
 0x38e   :  { %v920_v2 = vpop.eup %919  ;;  %872 = vmatpush3.msra.mxu1 %v543_v1  ;;  %873 = vmatprep.mubr.msk.f32.mxu1 %vm1000_vm1, %v999_v0 }
 0x38f   :  { %v541_v3 = vmul.f32 %v920_v2, %v912_v49  ;;  %881 = vmatprep.subr.mxu1 %v999_v0 }
 0x391   :  { %874 = vmatmul.mubr.msk.f32.vlgmr.msra.gmra.mrb[6].mxu1 %vm202_vm3, %v541_v3 }
 0x392   :  { %883 = vmatprep.mubr.msk.f32.mxu1 %vm1000_vm1, %v999_v0 }
 0x3b4   :  { %v704_v4 = vpop.xlane.xlu1 %703 }
 0x3b5   :  { %921 = vrcp.f32 %v704_v4 }
 0x3b8   :  { %v708_v5 = vpop.permute.xlu1 %707 }
 0x3b9   :  { %882 = vmatpush3.msra.mxu1 %v708_v5 }
 0x3bf   :  { %v922_v6 = vpop.eup %921 }
 0x3c0   :  { %v706_v7 = vmul.f32 %v922_v6, %v914_v54 }
 0x3c2   :  { %884 = vmatmul.mubr.msk.f32.vlgmr.msra.gmra.mrb[8].mxu1 %vm202_vm3, %v706_v7 }
 0x45c   :  { %v283_v8 = vpop.f32.mrb[2].mxu1 }
 0x45d   :  { %v855_v9 = vpop.f32.mrb[3].mxu1 }
 0x460   :  { %v449_v10 = vpop.f32.mrb[4].mxu1 }
 0x461   :  { %784 = vrot.lane.b32.xlu0 %v449_v10, %s1004_s8  ;;  %v865_v11 = vpop.f32.mrb[5].mxu1 }
 0x464   :  { %v614_v12 = vpop.f32.mrb[6].mxu1 }
 0x465   :  { %788 = vrot.lane.b32.xlu1 %v614_v12, %s1001_s1  ;;  %v875_v13 = vpop.f32.mrb[7].mxu1 }
 0x495   :  { %v779_v14 = vpop.f32.mrb[8].mxu1 }
 0x496   :  { %792 = vrot.lane.b32.xlu0 %v779_v14, %s1005_s9  ;;  %v885_v0 = vpop.f32.mrb[9].mxu1 }
 0x4d3   :  { %v785_v15 = vpop.permute.xlu0 %784 }
 0x4d4   :  { %v795_v17 = vsel %vm47_vm0, %v283_v8, %v785_v15 }
 0x4d7   :  { %v789_v16 = vpop.permute.xlu1 %788 }
 0x4d8   :  { %v797_v18 = vsel %vm796_vm4, %v795_v17, %v789_v16 }
 0x508   :  { %v793_v19 = vpop.permute.xlu0 %792 }
 0x509   :  { %v799_v20 = vsel %vm798_vm5, %v797_v18, %v793_v19 }
 0x50a   :  { %800 = vst [vmem:[#allocation7] sm:$0xff] %v799_v20 }
 0x50b   :  { %978 = shalt.err (!%p975_p6)
}
 0x50c   :  { %s979_s16 = scalar_lea.hbm %s1132_s2, 128 }
 0x50d   :  { %p980_p7 = scmp.ne.s32.totalorder %s1132_s2, %s979_s16  ;;  %p983_p8 = scmp.lt.u32.totalorder %s979_s16, %s1132_s2 }
 0x50f   :  { %p985_p9 = pnand %p983_p8, %p980_p7 }
 0x511   :  { %988 = shalt.err (!%p985_p9)
}
 0x512   :  { %810 = dma.vmem_to_hbm [thread:$0]  %s808_s12, 128, %s1132_s2, [#allocation4]  }
 0x513   :  { %993 = dma.done.wait [#allocation4], 128  }
 0x514   :  { %994 = vsyncadd [#allocation4], 4294967168 }
 0x515   :  { %814 = vsyncpa [#allocation3], 1 }
 0x516   :  { %815 = vsyncpa [#allocation6], 1 }
 0x517   :  { %816 = vsyncpa [#allocation4], 1 }

</bundles_post_ra>
